<compile_context>
chip_gen: v5e
topology: v5e:2x2
jax: 0.10.0
libtpu: 0.0.40
codegen_flags: <defaults>
</compile_context>

<pallas_src>
import jax
import jax.numpy as jnp
from jax import lax
from jax.experimental import pallas as pl
from jax.experimental.pallas import tpu as pltpu


def _round_up(x, m):
    return (x + m - 1) // m * m


def _vmem_capacity_bytes():
    """Physical VMEM of the local chip; conservative default if unavailable."""
    try:
        info = pltpu.get_tpu_info()
        cap = getattr(info, "vmem_capacity_bytes", None)
        if cap:
            return int(cap)
    except Exception:
        pass
    return 64 << 20  # v7x per-TensorCore VMEM (the smallest of v5e/v6e/v7x)


def _sublane_multiple(*dtypes):
    """Min batch-tile multiple so every streamed dtype meets its min tile."""
    m = 8
    for dt in dtypes:
        m = max(m, 8 * max(1, 4 // jnp.dtype(dt).itemsize))
    return m


# ---------------------------------------------------------------------------
# Kernels
# ---------------------------------------------------------------------------
def _distmult_fused_kernel(ids_ref, rel_ref, h_ref, t_ref, o_ref):
    """Fused gather + triple-product + lane reduction.

    ids_ref: (bt, 1)  int32        relation index per row
    rel_ref: (Rp, D)  native dtype full (padded) relation table, VMEM-resident
    h_ref  : (bt, D)  native dtype head embeddings
    t_ref  : (bt, D)  native dtype tail embeddings
    o_ref  : (bt, 1)  float32      scores
    """
    ids = ids_ref[...]                              # (bt, 1)
    bt = ids.shape[0]
    rp = rel_ref.shape[0]
    # One-hot row selection on the (otherwise idle) MXU; exact since the
    # weights are 0/1 and the table is up-cast to f32 first.
    onehot = (ids == lax.broadcasted_iota(jnp.int32, (bt, rp), 1)).astype(jnp.float32)
    rel = rel_ref[...].astype(jnp.float32)
    r = jnp.dot(onehot, rel, preferred_element_type=jnp.float32)    # (bt, D)
    h = h_ref[...].astype(jnp.float32)
    t = t_ref[...].astype(jnp.float32)
    o_ref[...] = jnp.sum(h * r * t, axis=-1, keepdims=True)


def _distmult_pregathered_kernel(h_ref, r_ref, t_ref, o_ref):
    """Fallback: relation rows already gathered outside the kernel."""
    h = h_ref[...].astype(jnp.float32)
    r = r_ref[...].astype(jnp.float32)
    t = t_ref[...].astype(jnp.float32)
    o_ref[...] = jnp.sum(h * r * t, axis=-1, keepdims=True)


# ---------------------------------------------------------------------------
# Wrapper
# ---------------------------------------------------------------------------
def distmult_forward(d1_embd, d2_embd, context_ids, relation, *,
                     bt=None,
                     max_bt=2048,
                     vmem_input_budget=16 << 20,   # per-step input working-set budget
                     rel_resident_limit=None):     # keep table in VMEM below this size
    """DistMult score: (d1_embd * relation[context_ids] * d2_embd).sum(-1).

    Inputs are streamed in their native dtype; math is done in f32 inside the
    kernel (matches the PyTorch numerics up to the storage rounding of the
    inputs themselves).

    Args:
      d1_embd: (B, D) head-entity embeddings (f32 / bf16 / ...).
      d2_embd: (B, D) tail-entity embeddings.
      context_ids: (B,) integer relation indices.
      relation: (R, D) relation embedding table.
      bt: optional explicit batch tile (multiple of the dtype sublane tile).
    Returns:
      (B,) float32 scores.
    """
    B, D = d1_embd.shape
    R = relation.shape[0]

    context_ids = context_ids.astype(jnp.int32)
    h_elt = jnp.dtype(d1_embd.dtype).itemsize
    t_elt = jnp.dtype(d2_embd.dtype).itemsize
    rel_elt = jnp.dtype(relation.dtype).itemsize

    cap = _vmem_capacity_bytes()
    sub = _sublane_multiple(d1_embd.dtype, d2_embd.dtype, relation.dtype)

    # --- pick the batch tile -------------------------------------------------
    # Bytes of VMEM per batch row: h/t streams double-buffered + the lane-padded
    # (bt,1) ids/output blocks (128-lane padding) + in-kernel f32 temporaries.
    lane_col = 128 * 4
    per_row = 2 * D * (h_elt + t_elt) + 4 * lane_col + 4 * D * 4
    if bt is None:
        bt = min(max_bt, max(sub, (vmem_input_budget // per_row) // sub * sub))
        # Keep >= 2 grid steps whenever B allows it so both v7x TensorCores are
        # fed by the "parallel" grid axis (v5e/v6e: one extra ~0.35us step).
        half = _round_up(max(1, -(-B // 2)), sub)
        bt = max(sub, min(bt, half))
    assert bt % sub == 0, f"batch tile must be a multiple of {sub} for these dtypes"

    # --- pad B up to a tile multiple (padded rows are zeros -> score 0, sliced off;
    #     padded ids are 0 -> always select a valid row).
    b_pad = _round_up(B, bt)
    if b_pad != B:
        pad = b_pad - B
        d1_embd = jnp.pad(d1_embd, ((0, pad), (0, 0)))
        d2_embd = jnp.pad(d2_embd, ((0, pad), (0, 0)))
        context_ids = jnp.pad(context_ids, ((0, pad),))

    grid = (b_pad // bt,)

    # --- resident-table decision: true single-buffer footprint vs a
    #     per-generation limit.
    rp = _round_up(max(R, 1), 8)
    table_bytes = rp * D * rel_elt
    if rel_resident_limit is None:
        rel_resident_limit = min(16 << 20, cap // 4)
    fuse_gather = table_bytes <= rel_resident_limit

    bytes_streamed = b_pad * D * (h_elt + t_elt) + b_pad * 4 + b_pad * 4

    if fuse_gather:
        rel_p = relation if rp == R else jnp.pad(relation, ((0, rp - R), (0, 0)))
        ids2d = context_ids.reshape(b_pad, 1)

        vmem_need = (2 * bt * D * (h_elt + t_elt)     # h, t double-buffered
                     + 2 * bt * lane_col              # ids (bt,1), double-buffered, lane-padded
                     + 2 * bt * lane_col              # output (bt,1), double-buffered, lane-padded
                     + table_bytes                    # resident relation table (single copy)
                     + bt * max(rp, 128) * 4          # one-hot temporary
                     + 4 * bt * D * 4)                # f32 temporaries (h, t, r, prod)
        vmem_limit = int(min(max(2 * vmem_need, 32 << 20), (cap * 3) // 4))

        cost = pl.CostEstimate(
            flops=int(2 * b_pad * D * (rp + 2)),
            transcendentals=0,
            bytes_accessed=int(bytes_streamed + table_bytes),
        )

        out = pl.pallas_call(
            _distmult_fused_kernel,
            out_shape=jax.ShapeDtypeStruct((b_pad, 1), jnp.float32),
            grid_spec=pltpu.PrefetchScalarGridSpec(
                num_scalar_prefetch=0,
                grid=grid,
                in_specs=[
                    pl.BlockSpec((bt, 1), lambda i: (i, 0)),        # relation ids
                    pl.BlockSpec(memory_space=pltpu.MemorySpace.VMEM),  # table: resident, single copy
                    pl.BlockSpec((bt, D), lambda i: (i, 0)),        # head embeddings
                    pl.BlockSpec((bt, D), lambda i: (i, 0)),        # tail embeddings
                ],
                out_specs=pl.BlockSpec((bt, 1), lambda i: (i, 0)),
            ),
            compiler_params=pltpu.CompilerParams(
                dimension_semantics=("parallel",),
                vmem_limit_bytes=vmem_limit,
            ),
            cost_estimate=cost,
        )(ids2d, rel_p, d1_embd, d2_embd)
    else:
        # TODO(synk): replace this XLA gather round-trip with an in-kernel DMA
        # gather (relation kept in HBM via memory_space=pl.ANY + scalar-prefetched
        # ids) so the large-R fallback avoids the extra HBM write+read pass.
        r_gathered = jnp.take(relation, context_ids, axis=0)        # (b_pad, D), native dtype

        vmem_need = (2 * bt * D * (h_elt + t_elt + rel_elt)
                     + 2 * bt * lane_col
                     + 4 * bt * D * 4)
        vmem_limit = int(min(max(2 * vmem_need, 32 << 20), (cap * 3) // 4))

        cost = pl.CostEstimate(
            flops=int(4 * b_pad * D),
            transcendentals=0,
            bytes_accessed=int(bytes_streamed + b_pad * D * rel_elt),
        )

        out = pl.pallas_call(
            _distmult_pregathered_kernel,
            out_shape=jax.ShapeDtypeStruct((b_pad, 1), jnp.float32),
            grid_spec=pltpu.PrefetchScalarGridSpec(
                num_scalar_prefetch=0,
                grid=grid,
                in_specs=[
                    pl.BlockSpec((bt, D), lambda i: (i, 0)),
                    pl.BlockSpec((bt, D), lambda i: (i, 0)),
                    pl.BlockSpec((bt, D), lambda i: (i, 0)),
                ],
                out_specs=pl.BlockSpec((bt, 1), lambda i: (i, 0)),
            ),
            compiler_params=pltpu.CompilerParams(
                dimension_semantics=("parallel",),
                vmem_limit_bytes=vmem_limit,
            ),
            cost_estimate=cost,
        )(d1_embd, r_gathered, d2_embd)

    return out[:B, 0]


def init_relation(key, rel_tot, dim):
    """Deterministic xavier_uniform_ init matching nn.init.xavier_uniform_."""
    bound = (6.0 / (rel_tot + dim)) ** 0.5
    return jax.random.uniform(
        key, (rel_tot, dim), dtype=jnp.float32, minval=-bound, maxval=bound
    )


if __name__ == "__main__":
    key = jax.random.PRNGKey(0)

    # --- test 1: small f32 shapes consistent with the module's forward -----
    B, D, R = 8, 128, 4
    k_rel, k_h, k_t, k_ctx = jax.random.split(key, 4)
    relation = init_relation(k_rel, R, D)                          # (R, D)
    d1_embd = jax.random.normal(k_h, (B, D), dtype=jnp.float32)    # (B, D)
    d2_embd = jax.random.normal(k_t, (B, D), dtype=jnp.float32)    # (B, D)
    context_ids = jax.random.randint(k_ctx, (B,), 0, R, dtype=jnp.int32)

    score = distmult_forward(d1_embd, d2_embd, context_ids, relation)
    score = jax.block_until_ready(score)
    ref = jnp.sum(d1_embd * relation[context_ids] * d2_embd, axis=-1)
    assert score.shape == (B,)
    assert jnp.allclose(score, ref, atol=1e-5, rtol=1e-5)

    # --- test 2: bf16 streams, B not a multiple of the tile, multi-step grid
    B2, R2 = 200, 5
    k_rel2, k_h2, k_t2, k_ctx2 = jax.random.split(jax.random.PRNGKey(1), 4)
    relation2 = init_relation(k_rel2, R2, D).astype(jnp.bfloat16)
    d1_2 = jax.random.normal(k_h2, (B2, D), dtype=jnp.float32).astype(jnp.bfloat16)
    d2_2 = jax.random.normal(k_t2, (B2, D), dtype=jnp.float32).astype(jnp.bfloat16)
    ctx2 = jax.random.randint(k_ctx2, (B2,), 0, R2, dtype=jnp.int32)

    score2 = distmult_forward(d1_2, d2_2, ctx2, relation2, bt=64)  # grid > 1 + padding path
    score2 = jax.block_until_ready(score2)
    ref2 = jnp.sum(d1_2.astype(jnp.float32)
                   * relation2[ctx2].astype(jnp.float32)
                   * d2_2.astype(jnp.float32), axis=-1)
    assert score2.shape == (B2,)
    assert jnp.allclose(score2, ref2, atol=1e-4, rtol=1e-4)

    # --- test 3: force the large-R fallback path (pre-gathered relations) ---
    B3, R3 = 32, 4
    k_rel3, k_h3, k_t3, k_ctx3 = jax.random.split(jax.random.PRNGKey(2), 4)
    relation3 = init_relation(k_rel3, R3, D)
    d1_3 = jax.random.normal(k_h3, (B3, D), dtype=jnp.float32)
    d2_3 = jax.random.normal(k_t3, (B3, D), dtype=jnp.float32)
    ctx3 = jax.random.randint(k_ctx3, (B3,), 0, R3, dtype=jnp.int32)

    score3 = distmult_forward(d1_3, d2_3, ctx3, relation3, rel_resident_limit=0)
    score3 = jax.block_until_ready(score3)
    ref3 = jnp.sum(d1_3 * relation3[ctx3] * d2_3, axis=-1)
    assert score3.shape == (B3,)
    assert jnp.allclose(score3, ref3, atol=1e-5, rtol=1e-5)

    print("KERNEL_OK")
</pallas_src>

<mosaic_0001>
module attributes {stable_mosaic.version = 11 : i64} {
  func.func @_distmult_fused_kernel(%arg0: i32, %arg1: memref<8x1xi32, #tpu.memory_space<vmem>>, %arg2: memref<8x128xf32, #tpu.memory_space<vmem>>, %arg3: memref<8x128xf32, #tpu.memory_space<vmem>>, %arg4: memref<8x128xf32, #tpu.memory_space<vmem>>, %arg5: memref<8x1xf32, #tpu.memory_space<vmem>>) attributes {dimension_semantics = [#tpu.dimension_semantics<parallel>], iteration_bounds = array<i64: 1>, scalar_prefetch = 0 : i64, scratch_operands = 0 : i64, tpu.core_type = #tpu.core_type<tc>, window_params = [{transform_indices = @transform_0, window_bounds = array<i64: 8, 1>}, {pipeline_mode = #tpu.pipeline_mode<synchronous>, transform_indices = @transform_1, window_bounds = array<i64: 8, 128>}, {transform_indices = @transform_2, window_bounds = array<i64: 8, 128>}, {transform_indices = @transform_3, window_bounds = array<i64: 8, 128>}, {transform_indices = @transform_4, window_bounds = array<i64: 8, 1>}]} {
    %c0 = arith.constant 0 : index
    %c0_0 = arith.constant 0 : index
    %0 = vector.load %arg1[%c0, %c0_0] : memref<8x1xi32, #tpu.memory_space<vmem>>, vector<8x1xi32>
    %1 = tpu.iota {dimensions = array<i32: 1>} : vector<8x8xi32>
    %2 = vector.broadcast %0 : vector<8x1xi32> to vector<8x8xi32>
    %3 = arith.cmpi eq, %2, %1 : vector<8x8xi32>
    %4 = arith.extui %3 : vector<8x8xi1> to vector<8x8xi32>
    %5 = arith.sitofp %4 : vector<8x8xi32> to vector<8x8xf32>
    %c0_1 = arith.constant 0 : index
    %c0_2 = arith.constant 0 : index
    %6 = vector.load %arg2[%c0_1, %c0_2] : memref<8x128xf32, #tpu.memory_space<vmem>>, vector<8x128xf32>
    %cst = arith.constant dense<0.000000e+00> : vector<8x128xf32>
    %7 = tpu.matmul %5, %6, %cst {dimension_numbers = #tpu.dot_dimension_numbers<[1], [0], [0], [1], [0, 0, 1, 1], [], []>} : vector<8x8xf32>, vector<8x128xf32>, vector<8x128xf32> -> vector<8x128xf32>
    %c0_3 = arith.constant 0 : index
    %c0_4 = arith.constant 0 : index
    %8 = vector.load %arg3[%c0_3, %c0_4] : memref<8x128xf32, #tpu.memory_space<vmem>>, vector<8x128xf32>
    %c0_5 = arith.constant 0 : index
    %c0_6 = arith.constant 0 : index
    %9 = vector.load %arg4[%c0_5, %c0_6] : memref<8x128xf32, #tpu.memory_space<vmem>>, vector<8x128xf32>
    %10 = arith.mulf %8, %7 : vector<8x128xf32>
    %11 = arith.mulf %10, %9 : vector<8x128xf32>
    %cst_7 = arith.constant dense<0.000000e+00> : vector<8xf32>
    %12 = vector.multi_reduction <add>, %11, %cst_7 [1] : vector<8x128xf32> to vector<8xf32>
    %13 = vector.shape_cast %12 : vector<8xf32> to vector<8x1xf32>
    %c0_8 = arith.constant 0 : index
    %c0_9 = arith.constant 0 : index
    %14 = vector.load %arg5[%c0_8, %c0_9] : memref<8x1xf32, #tpu.memory_space<vmem>>, vector<8x1xf32>
    tpu.vector_store %arg5[%c0_8, %c0_9], %13 {strides = array<i32>} : memref<8x1xf32, #tpu.memory_space<vmem>>, vector<8x1xf32>,
    return
  }
  func.func @transform_0(%arg0: i32) -> (i32, i32) {
    %c0_i32 = arith.constant 0 : i32
    %c0_i32_0 = arith.constant 0 : i32
    return %arg0, %c0_i32 : i32, i32
  }
  func.func @transform_1(%arg0: i32) -> (i32, i32) {
    %c0_i32 = arith.constant 0 : i32
    %c0_i32_0 = arith.constant 0 : i32
    %c0_i32_1 = arith.constant 0 : i32
    return %c0_i32, %c0_i32_0 : i32, i32
  }
  func.func @transform_2(%arg0: i32) -> (i32, i32) {
    %c0_i32 = arith.constant 0 : i32
    %c0_i32_0 = arith.constant 0 : i32
    return %arg0, %c0_i32 : i32, i32
  }
  func.func @transform_3(%arg0: i32) -> (i32, i32) {
    %c0_i32 = arith.constant 0 : i32
    %c0_i32_0 = arith.constant 0 : i32
    return %arg0, %c0_i32 : i32, i32
  }
  func.func @transform_4(%arg0: i32) -> (i32, i32) {
    %c0_i32 = arith.constant 0 : i32
    %c0_i32_0 = arith.constant 0 : i32
    return %arg0, %c0_i32 : i32, i32
  }
}

</mosaic_0001>

<bundles_post_ra>
// kernel: tpu_custom_call.1
= control target key start
LH: loop header
LB: loop body
LE: loop exit
PB: predicated region body
PF: predicated region fallthrough
CT: control target
= control target key end

     0   :  { %9 = vsyncpa [#allocation3], 0  ;;  %s196_s0 = inlined_call_operand.vmem [shape: s32[8,1], index: 0, kind: input, shape index: {}]   ;;  %s197_s1 = inlined_call_operand.vmem [shape: f32[8,128], index: 1, kind: input, shape index: {}]   ;;  %s198_s2 = inlined_call_operand.hbm [shape: f32[8,128], index: 2, kind: input, shape index: {}]   ;;  %s199_s3 = inlined_call_operand.hbm [shape: f32[8,128], index: 3, kind: input, shape index: {}]   ;;  %s200_s4 = inlined_call_operand.vmem [shape: f32[8,1], index: 4, kind: output, shape index: {}]  }
   0x1   :  { %s20_s17 = sshll.u32 %s198_s2, 4  ;;  %s21_s17 = int_to_ptr.hbm [resolvable:$true] %s20_s17 }
   0x2   :  { %10 = vsyncpa [#allocation5], 0  ;;  %s152_s18 = smov [#allocation2]   ;;  %s31_s22 = sshll.u32 %s199_s3, 4  ;;  %s32_s22 = int_to_ptr.hbm [resolvable:$true] %s31_s22 }
   0x3   :  { %s22_s19 = sshll.u32 %s152_s18, 4  ;;  %s153_s23 = smov [#allocation4]   ;;  %s23_s19 = int_to_ptr.vmem [resolvable:$true] %s22_s19 }
   0x4   :  { %25 = dma.hbm_to_vmem [thread:$0]  %s21_s17, 128, %s23_s19, [#allocation3]  }
   0x5   :  { %s33_s24 = sshll.u32 %s153_s23, 4  ;;  %s34_s24 = int_to_ptr.vmem [resolvable:$true] %s33_s24 }
   0x6   :  { %36 = dma.hbm_to_vmem [thread:$0]  %s32_s22, 128, %s34_s24, [#allocation5]  }
   0x7   :  { %148 = dma.done.wait [#allocation3], 128  }
   0x8   :  { %149 = vsyncadd [#allocation3], 4294967168 }
   0x9   :  { %150 = dma.done.wait [#allocation5], 128  }
   0xa   :  { %151 = vsyncadd [#allocation5], 4294967168  ;;  %v154_v0 = vmov 0   ;;  %v45_v1 = vld [vmem:[%s196_s0] sm:$0xff]  ;;  %v46_v3 = vlaneseq  ;;  %vm55_vm0 = vcmask 64512   ;;  %v155_v6 = vmov 0.0  }
   0xb   :  { %99 = vset.pattern.permute.xlu0 %v154_v0  ;;  %v54_v2 = vld [vmem:[%s197_s1] sm:$0xff]  ;;  %v80_v10 = vld [vmem:[#allocation4] sm:$0xff]  ;;  %vm85_vm2 = vcmask 7168  }
   0xc   :  { %49 = vperm.xlu0 %99, %v45_v1   ;;  %74 = vmatpush.msra.mxu0 %v54_v2  ;;  %v47_v4 = vand.u32 127, %v46_v3  ;;  %v79_v8 = vld [vmem:[#allocation2] sm:$0xff] }
  0x7e   :  { %v50_v5 = vpop.permute.xlu0 %49 }
  0x7f   :  { %vm51_vm1 = vcmp.eq.s32.totalorder %v50_v5, %v47_v4 }
  0x80   :  { %v93_v7 = vsel %vm51_vm1, 1.0, %v155_v6 }
  0x81   :  { %94 = vmatmul.msk.f32.vlgmr.msra.gmra.mxu0 %vm55_vm0, %v93_v7 }
  0xfe   :  { %v76_v9 = vpop.f32.mrf.mxu0 }
  0xff   :  { %v81_v11 = vmul.f32 %v79_v8, %v76_v9 }
 0x101   :  { %v82_v12 = vmul.f32 %v81_v11, %v80_v10 }
 0x103   :  { %83 = vadd.xlane.f32.xlu0 %v82_v12 }
 0x176   :  { %v84_v13 = vpop.xlane.xlu0 %83 }
 0x177   :  { %86 = vst.msk [vmem:[%s200_s4] sm:$0xff] %vm85_vm2, %v84_v13 }
 0x178   :  { %91 = vsyncpa [#allocation3], 1 }
 0x179   :  { %92 = vsyncpa [#allocation5], 1 }

</bundles_post_ra>
